<compile_context>
chip_gen: v7x
topology: tpu7x:2x2x1
jax: 0.10.0
libtpu: 0.0.40
codegen_flags: <defaults>
</compile_context>

<pallas_src>
import math

import jax
import jax.numpy as jnp
from jax.experimental import pallas as pl
from jax.experimental.pallas import tpu as pltpu


def _round_up(x, m):
    return ((x + m - 1) // m) * m


def _pick_tile(dim, candidates):
    for c in candidates:
        if dim % c == 0:
            return c
    return dim


def _vmem_limit_bytes():
    # ~3/4 of physical VMEM: ~96 MiB on v5e/v6e (128 MiB), ~48 MiB on v7x (64 MiB).
    try:
        cap = int(pltpu.get_tpu_info().vmem_capacity_bytes)
    except Exception:
        cap = 64 * 1024 * 1024
    return max(32 * 1024 * 1024, (cap * 3) // 4)


# ---------------------------------------------------------------------------
# Phase 1: Xe_pre = H^T @ X, accumulated over N tiles (F_in-space).
#   ht_ref: [te, tn] bf16   x_ref: [tn, F_in_p] bf16
#   xe_ref: [te, F_in_p] bf16 (output, resident across k)
#   acc_ref: [te, F_in_p] f32 (VMEM scratch)
# grid = (n_e "parallel", n_n "arbitrary")
# ---------------------------------------------------------------------------
def xe_kernel(ht_ref, x_ref, xe_ref, acc_ref):
    k = pl.program_id(1)  # N-reduction axis (last, "arbitrary")

    @pl.when(k == 0)
    def _():
        acc_ref[...] = jnp.zeros_like(acc_ref)

    acc_ref[...] += jnp.dot(ht_ref[...], x_ref[...],
                            preferred_element_type=jnp.float32)

    @pl.when(k == pl.num_programs(1) - 1)
    def _():
        xe_ref[...] = acc_ref[...].astype(xe_ref.dtype)


# ---------------------------------------------------------------------------
# Phase 2: out = ((1 + eps) * X + H @ Xe_pre) @ W, E-reduction accumulated in
# F_in-space, final (small) projection by W in f32 in the finalize.
#   eps_ref: [1] f32 (SMEM)
#   x_ref : [tn, F_in_p] bf16 (resident across e)
#   h_ref : [tn, te] bf16     xe_ref: [te, F_in_p] bf16
#   w_ref : [F_in_p, Fp] f32  (resident)
#   o_ref : [tn, Fp] f32 (resident across e)
#   acc_ref: [tn, F_in_p] f32 (VMEM scratch)
# grid = (n_n "parallel", n_e "arbitrary")
# ---------------------------------------------------------------------------
def out_kernel(eps_ref, x_ref, h_ref, xe_ref, w_ref, o_ref, acc_ref):
    e = pl.program_id(1)  # E-reduction axis (last, "arbitrary")

    @pl.when(e == 0)
    def _():
        acc_ref[...] = (1.0 + eps_ref[0]) * x_ref[...].astype(jnp.float32)

    acc_ref[...] += jnp.dot(h_ref[...], xe_ref[...],
                            preferred_element_type=jnp.float32)

    @pl.when(e == pl.num_programs(1) - 1)
    def _():
        # Small [tn, F_in_p] @ [F_in_p, Fp] projection, fully f32 (precision).
        o_ref[...] = jnp.dot(acc_ref[...], w_ref[...],
                             preferred_element_type=jnp.float32
                             ).astype(o_ref.dtype)


def pyg_hyper_gin_conv(X, W, eps, vertex, edges, num_edges):
    """Forward pass. X: [N, F_in], W: [F_in, heads*F_out], eps: scalar."""
    N, F_in = X.shape
    F = W.shape[1]
    E = int(num_edges)

    # Padded, lane-dense shapes. Zero rows/columns are free in the math and are
    # sliced off at the end.
    F_in_p = _round_up(max(F_in, 128), 128)
    Fp = _round_up(max(F, 128), 128)
    Np = _round_up(max(N, 128), 128)
    Ep = _round_up(max(E, 128), 128)

    tn = _pick_tile(Np, (256, 128))          # full MXU M dim, bf16 sublane-packed
    te = _pick_tile(Ep, (512, 384, 256, 128))
    n_n = Np // tn
    n_e = Ep // te

    # Glue: dense incidence-count matrix (and its transpose) built once, directly
    # in the MXU dtype, from the (vertex, edges) pair lists.
    # NOTE: bf16 counts are exact only up to 256 repeated (vertex, edge) pairs.
    Hb = jnp.zeros((Np, Ep), jnp.bfloat16).at[vertex, edges].add(1.0)
    HTb = jnp.zeros((Ep, Np), jnp.bfloat16).at[edges, vertex].add(1.0)
    Xb = jnp.zeros((Np, F_in_p), jnp.bfloat16).at[:N, :F_in].set(
        X.astype(jnp.bfloat16))
    Wf = jnp.zeros((F_in_p, Fp), jnp.float32).at[:F_in, :F].set(
        W.astype(jnp.float32))
    eps_arr = jnp.asarray(eps, jnp.float32).reshape((1,))

    vmem_limit = _vmem_limit_bytes()

    # ---- Phase 1: Xe_pre = H^T @ X (N-reduction, E tiles parallel) -----------
    xe = pl.pallas_call(
        xe_kernel,
        out_shape=jax.ShapeDtypeStruct((Ep, F_in_p), jnp.bfloat16),
        grid=(n_e, n_n),
        in_specs=[
            pl.BlockSpec((te, tn), lambda e, k: (e, k)),        # H^T tile
            pl.BlockSpec((tn, F_in_p), lambda e, k: (k, 0)),    # X tile
        ],
        out_specs=pl.BlockSpec((te, F_in_p), lambda e, k: (e, 0)),
        scratch_shapes=[pltpu.VMEM((te, F_in_p), jnp.float32)],
        compiler_params=pltpu.CompilerParams(
            dimension_semantics=("parallel", "arbitrary"),
            vmem_limit_bytes=vmem_limit,
        ),
    )(HTb, Xb)

    # ---- Phase 2: out = ((1+eps) * X + H @ Xe_pre) @ W -----------------------
    out = pl.pallas_call(
        out_kernel,
        out_shape=jax.ShapeDtypeStruct((Np, Fp), jnp.float32),
        grid=(n_n, n_e),
        in_specs=[
            pl.BlockSpec(memory_space=pltpu.MemorySpace.SMEM),   # eps scalar
            pl.BlockSpec((tn, F_in_p), lambda i, e: (i, 0)),     # X tile (resident)
            pl.BlockSpec((tn, te), lambda i, e: (i, e)),         # H tile (streams)
            pl.BlockSpec((te, F_in_p), lambda i, e: (e, 0)),     # Xe tile (streams)
            pl.BlockSpec((F_in_p, Fp), lambda i, e: (0, 0)),     # W (resident)
        ],
        out_specs=pl.BlockSpec((tn, Fp), lambda i, e: (i, 0)),   # resident across e
        scratch_shapes=[pltpu.VMEM((tn, F_in_p), jnp.float32)],
        compiler_params=pltpu.CompilerParams(
            dimension_semantics=("parallel", "arbitrary"),
            vmem_limit_bytes=vmem_limit,
        ),
    )(eps_arr, Xb, Hb, xe, Wf)

    return out[:N, :F]


if __name__ == "__main__":
    # Small, deterministic problem consistent with the module's __init__/forward.
    N = 16              # number of nodes
    in_channels = 32
    heads = 8
    out_channels = 16   # -> feature dim heads * out_channels = 128
    E = 8               # number of hyperedges
    nnz = 48            # number of (vertex, edge) incidence pairs

    key = jax.random.PRNGKey(0)
    kx, kw, kv = jax.random.split(key, 3)

    X = jax.random.normal(kx, (N, in_channels), dtype=jnp.float32)
    # nn.Linear default init: U(-1/sqrt(fan_in), 1/sqrt(fan_in)); stored [F_in, F_out].
    bound = 1.0 / math.sqrt(in_channels)
    W = jax.random.uniform(kw, (in_channels, heads * out_channels),
                           minval=-bound, maxval=bound, dtype=jnp.float32)
    eps = jnp.float32(0.0)  # nn.Parameter(torch.FloatTensor([0]))

    vertex = jax.random.randint(kv, (nnz,), 0, N, dtype=jnp.int32)
    edges = (jnp.arange(nnz, dtype=jnp.int32) % E)  # every edge index appears

    out = pyg_hyper_gin_conv(X, W, eps, vertex, edges, E)
    out = jax.block_until_ready(out)

    # Pure-JAX f32 reference (mirrors the PyTorch scatter-sum semantics exactly).
    XW = X @ W
    Xve = XW[vertex]
    Xe = jax.ops.segment_sum(Xve, edges, num_segments=E)
    Xev = Xe[edges]
    Xv = jax.ops.segment_sum(Xev, vertex, num_segments=N)
    ref = (1.0 + eps) * XW + Xv

    assert out.shape == (N, heads * out_channels)
    # Kernel uses bf16 MXU inputs (X, H, Xe_pre) with f32 accumulation and an f32
    # final projection -> compare with bf16-level tolerance vs the f32 reference.
    assert jnp.allclose(out, ref, atol=5e-2, rtol=5e-2), "mismatch vs reference"
    print("KERNEL_OK")
</pallas_src>

<mosaic_0001>
module attributes {stable_mosaic.version = 11 : i64} {
  func.func @xe_kernel(%arg0: i32, %arg1: i32, %arg2: memref<128x128xbf16, #tpu.memory_space<vmem>>, %arg3: memref<128x128xbf16, #tpu.memory_space<vmem>>, %arg4: memref<128x128xbf16, #tpu.memory_space<vmem>>, %arg5: memref<128x128xf32, #tpu.memory_space<vmem>>) attributes {dimension_semantics = [#tpu.dimension_semantics<parallel>, #tpu.dimension_semantics<arbitrary>], iteration_bounds = array<i64: 1, 1>, scalar_prefetch = 0 : i64, scratch_operands = 1 : i64, tpu.core_type = #tpu.core_type<tc>, window_params = [{transform_indices = @transform_0, window_bounds = array<i64: 128, 128>}, {transform_indices = @transform_1, window_bounds = array<i64: 128, 128>}, {transform_indices = @transform_2, window_bounds = array<i64: 128, 128>}]} {
    %c0_i32 = arith.constant 0 : i32
    %0 = arith.cmpi eq, %arg1, %c0_i32 : i32
    %1 = arith.extui %0 : i1 to i32
    %c0_i32_0 = arith.constant 0 : i32
    %2 = arith.cmpi ne, %1, %c0_i32_0 : i32
    scf.if %2 {
      %cst_10 = arith.constant 0.000000e+00 : f32
      %12 = vector.broadcast %cst_10 : f32 to vector<128x128xf32>
      %c0_11 = arith.constant 0 : index
      %c0_12 = arith.constant 0 : index
      %13 = vector.load %arg5[%c0_11, %c0_12] : memref<128x128xf32, #tpu.memory_space<vmem>>, vector<128x128xf32>
      tpu.vector_store %arg5[%c0_11, %c0_12], %12 {strides = array<i32>} : memref<128x128xf32, #tpu.memory_space<vmem>>, vector<128x128xf32>,
    } else {
    }
    %c0 = arith.constant 0 : index
    %c0_1 = arith.constant 0 : index
    %3 = vector.load %arg5[%c0, %c0_1] : memref<128x128xf32, #tpu.memory_space<vmem>>, vector<128x128xf32>
    %c0_2 = arith.constant 0 : index
    %c0_3 = arith.constant 0 : index
    %4 = vector.load %arg2[%c0_2, %c0_3] : memref<128x128xbf16, #tpu.memory_space<vmem>>, vector<128x128xbf16>
    %c0_4 = arith.constant 0 : index
    %c0_5 = arith.constant 0 : index
    %5 = vector.load %arg3[%c0_4, %c0_5] : memref<128x128xbf16, #tpu.memory_space<vmem>>, vector<128x128xbf16>
    %cst = arith.constant dense<0.000000e+00> : vector<128x128xf32>
    %6 = tpu.matmul %4, %5, %cst {dimension_numbers = #tpu.dot_dimension_numbers<[1], [0], [0], [1], [0, 0, 1, 1], [], []>} : vector<128x128xbf16>, vector<128x128xbf16>, vector<128x128xf32> -> vector<128x128xf32>
    %7 = arith.addf %3, %6 : vector<128x128xf32>
    %c0_6 = arith.constant 0 : index
    %c0_7 = arith.constant 0 : index
    %8 = vector.load %arg5[%c0_6, %c0_7] : memref<128x128xf32, #tpu.memory_space<vmem>>, vector<128x128xf32>
    tpu.vector_store %arg5[%c0_6, %c0_7], %7 {strides = array<i32>} : memref<128x128xf32, #tpu.memory_space<vmem>>, vector<128x128xf32>,
    %c0_i32_8 = arith.constant 0 : i32
    %9 = arith.cmpi eq, %arg1, %c0_i32_8 : i32
    %10 = arith.extui %9 : i1 to i32
    %c0_i32_9 = arith.constant 0 : i32
    %11 = arith.cmpi ne, %10, %c0_i32_9 : i32
    scf.if %11 {
      %c0_10 = arith.constant 0 : index
      %c0_11 = arith.constant 0 : index
      %12 = vector.load %arg5[%c0_10, %c0_11] : memref<128x128xf32, #tpu.memory_space<vmem>>, vector<128x128xf32>
      %13 = arith.truncf %12 : vector<128x128xf32> to vector<128x128xbf16>
      %c0_12 = arith.constant 0 : index
      %c0_13 = arith.constant 0 : index
      %14 = vector.load %arg4[%c0_12, %c0_13] : memref<128x128xbf16, #tpu.memory_space<vmem>>, vector<128x128xbf16>
      tpu.vector_store %arg4[%c0_12, %c0_13], %13 {strides = array<i32>} : memref<128x128xbf16, #tpu.memory_space<vmem>>, vector<128x128xbf16>,
    } else {
    }
    return
  }
  func.func @transform_0(%arg0: i32, %arg1: i32) -> (i32, i32) {
    %c0_i32 = arith.constant 0 : i32
    return %arg0, %arg1 : i32, i32
  }
  func.func @transform_1(%arg0: i32, %arg1: i32) -> (i32, i32) {
    %c0_i32 = arith.constant 0 : i32
    %c0_i32_0 = arith.constant 0 : i32
    return %arg1, %c0_i32 : i32, i32
  }
  func.func @transform_2(%arg0: i32, %arg1: i32) -> (i32, i32) {
    %c0_i32 = arith.constant 0 : i32
    %c0_i32_0 = arith.constant 0 : i32
    return %arg0, %c0_i32 : i32, i32
  }
}

</mosaic_0001>

<bundles_post_ra>
// kernel: tpu_custom_call.1
= control target key start
LH: loop header
LB: loop body
LE: loop exit
PB: predicated region body
PF: predicated region fallthrough
CT: control target
= control target key end

     0   :  { %7 = vsyncpa [#allocation4], 0  ;;  %s768_s0 = inlined_call_operand.hbm [shape: bf16[128,128], index: 0, kind: input, shape index: {}]   ;;  %s769_s1 = inlined_call_operand.hbm [shape: bf16[128,128], index: 1, kind: input, shape index: {}]   ;;  %s770_s2 = inlined_call_operand.hbm [shape: bf16[128,128], index: 2, kind: output, shape index: {}]  }
   0x1   :  { %8 = vsyncpa [#allocation7], 0 }
   0x2   :  { %9 = vsyncpa [#allocation5], 0  ;;  %s703_s9 = smov [#allocation3]   ;;  %s631_s13 = scalar_lea.hbm %s768_s0, 1024 }
   0x3   :  { %s15_s10 = sshll.u32 %s703_s9, 4  ;;  %p632_p0 = scmp.ne.s32.totalorder %s768_s0, %s631_s13  ;;  %s16_s10 = int_to_ptr.vmem [resolvable:$true] %s15_s10 }
   0x4   :  { %p635_p1 = scmp.lt.u32.totalorder %s631_s13, %s768_s0 }
   0x6   :  { %p637_p2 = pnand %p635_p1, %p632_p0 }
   0x8   :  { %640 = shalt.err (!%p637_p2)
}
   0x9   :  { %s641_s18 = scalar_lea.vmem %s16_s10, 1024  ;;  %p646_p4 = scmp.lt.s32.totalorder %s16_s10, %s16_s10 }
   0xa   :  { %p642_p3 = scmp.ne.s32.totalorder %s16_s10, %s641_s18  ;;  %p647_p5 = scmp.lt.s32.totalorder %s641_s18, %s641_s18 }
   0xc   :  { %p648_p6 = por %p647_p5, %p646_p4 }
   0xe   :  { %p649_p7 = pnand %p648_p6, %p642_p3 }
  0x10   :  { %652 = shalt.err (!%p649_p7)
}
  0x11   :  { %s704_s19 = smov 64   ;;  %s705_s20 = smov 4  }
  0x12   :  { %21 = dma.hbm_to_vmem [thread:$0]  %s768_s0, 1024, %s16_s10, [#allocation4], %s704_s19, %s704_s19, %s705_s20  }
  0x13   :  { %s706_s23 = smov [#allocation6]   ;;  %s653_s27 = scalar_lea.hbm %s769_s1, 1024 }
  0x14   :  { %s27_s24 = sshll.u32 %s706_s23, 4  ;;  %p654_p8 = scmp.ne.s32.totalorder %s769_s1, %s653_s27  ;;  %s28_s24 = int_to_ptr.vmem [resolvable:$true] %s27_s24 }
  0x15   :  { %p657_p9 = scmp.lt.u32.totalorder %s653_s27, %s769_s1 }
  0x17   :  { %p659_p10 = pnand %p657_p9, %p654_p8 }
  0x19   :  { %662 = shalt.err (!%p659_p10)
}
  0x1a   :  { %s663_s4 = scalar_lea.vmem %s28_s24, 1024  ;;  %p668_p12 = scmp.lt.s32.totalorder %s28_s24, %s28_s24 }
  0x1b   :  { %p664_p11 = scmp.ne.s32.totalorder %s28_s24, %s663_s4  ;;  %p669_p13 = scmp.lt.s32.totalorder %s663_s4, %s663_s4 }
  0x1d   :  { %p670_p0 = por %p669_p13, %p668_p12 }
  0x1f   :  { %p671_p1 = pnand %p670_p0, %p664_p11 }
  0x21   :  { %674 = shalt.err (!%p671_p1)
}
  0x22   :  { %33 = dma.hbm_to_vmem [thread:$0]  %s769_s1, 1024, %s28_s24, [#allocation7], %s704_s19, %s704_s19, %s705_s20  }
  0x23   :  { %697 = dma.done.wait [#allocation4], 1024  }
  0x24   :  { %698 = vsyncadd [#allocation4], 4294966272 }
  0x25   :  { %699 = dma.done.wait [#allocation7], 1024  }
  0x26   :  { %700 = vsyncadd [#allocation7], 4294966272  ;;  %v615_v0 = vld [vmem:[#allocation6] sm:$0xff]   ;;  %v616_v1 = vld [vmem:[#allocation6 + $0x8] sm:$0xff]   ;;  %s707_s1 = smov [#allocation8]  }
  0x27   :  { %562 = vmatprep.subr.bf16.mxu0 %v615_v0  ;;  %594 = vmatprep.subr.bf16.mxu1 %v615_v0  ;;  %v617_v2 = vld [vmem:[#allocation6 + $0x10] sm:$0xff]   ;;  %v618_v3 = vld [vmem:[#allocation6 + $0x18] sm:$0xff]   ;;  %v623_v4 = vld [vmem:[#allocation3] sm:$0xff]   ;;  %s438_s6 = sshll.u32 %s707_s1, 4  ;;  %s439_s6 = int_to_ptr.vmem [resolvable:$true] %s438_s6 }
  0x28   :  { %563 = vmatpush3.bf16.msra.mxu0 %v615_v0  ;;  %602 = vmatpush3.bf16.msra.mxu1 %v615_v0  ;;  %v624_v5 = vld [vmem:[#allocation3 + $0x20] sm:$0xff]   ;;  %v620_v7 = vld [vmem:[#allocation6 + $0x28] sm:$0xff]   ;;  %v621_v8 = vld [vmem:[#allocation6 + $0x30] sm:$0xff]   ;;  %s675_s7 = scalar_lea.vmem %s439_s6, 1024  ;;  %p680_p3 = scmp.lt.s32.totalorder %s439_s6, %s439_s6 }
  0x29   :  { %564 = vmatprep.subr.bf16.mxu0 %v616_v1  ;;  %595 = vmatprep.subr.bf16.mxu1 %v616_v1  ;;  %v619_v6 = vld [vmem:[#allocation6 + $0x20] sm:$0xff]   ;;  %v622_v9 = vld [vmem:[#allocation6 + $0x38] sm:$0xff]   ;;  %v625_v10 = vld [vmem:[#allocation3 + $0x8] sm:$0xff]   ;;  %p676_p2 = scmp.ne.s32.totalorder %s439_s6, %s675_s7  ;;  %p681_p4 = scmp.lt.s32.totalorder %s675_s7, %s675_s7 }
  0x2a   :  { %578 = vmatprep.mubr.bf16.mxu0 %v623_v4  ;;  %586 = vmatprep.mubr.bf16.mxu1 %v624_v5  ;;  %v626_v11 = vld [vmem:[#allocation3 + $0x28] sm:$0xff]   ;;  %v627_v12 = vld [vmem:[#allocation3 + $0x10] sm:$0xff]   ;;  %v629_v14 = vld [vmem:[#allocation3 + $0x18] sm:$0xff]  }
  0x2b   :  { %v628_v13 = vld [vmem:[#allocation3 + $0x30] sm:$0xff]   ;;  %v630_v15 = vld [vmem:[#allocation3 + $0x38] sm:$0xff]   ;;  %p682_p5 = por %p681_p4, %p680_p3 }
  0x2c   :  { %565 = vmatpush3.bf16.msra.mxu0 %v616_v1  ;;  %603 = vmatpush3.bf16.msra.mxu1 %v616_v1 }
  0x2d   :  { %566 = vmatprep.subr.bf16.mxu0 %v617_v2  ;;  %596 = vmatprep.subr.bf16.mxu1 %v617_v2  ;;  %p683_p6 = pnand %p682_p5, %p676_p2 }
  0x30   :  { %567 = vmatpush3.bf16.msra.mxu0 %v617_v2  ;;  %604 = vmatpush3.bf16.msra.mxu1 %v617_v2 }
  0x31   :  { %568 = vmatprep.subr.bf16.mxu0 %v618_v3  ;;  %597 = vmatprep.subr.bf16.mxu1 %v618_v3 }
  0x34   :  { %569 = vmatpush3.bf16.msra.mxu0 %v618_v3  ;;  %605 = vmatpush3.bf16.msra.mxu1 %v618_v3 }
  0x35   :  { %570 = vmatprep.subr.bf16.mxu0 %v619_v6  ;;  %598 = vmatprep.subr.bf16.mxu1 %v619_v6 }
  0x38   :  { %571 = vmatpush3.bf16.msra.mxu0 %v619_v6  ;;  %606 = vmatpush3.bf16.msra.mxu1 %v619_v6 }
  0x39   :  { %572 = vmatprep.subr.bf16.mxu0 %v620_v7  ;;  %599 = vmatprep.subr.bf16.mxu1 %v620_v7 }
  0x3c   :  { %573 = vmatpush3.bf16.msra.mxu0 %v620_v7  ;;  %607 = vmatpush3.bf16.msra.mxu1 %v620_v7 }
  0x3d   :  { %574 = vmatprep.subr.bf16.mxu0 %v621_v8  ;;  %600 = vmatprep.subr.bf16.mxu1 %v621_v8 }
  0x40   :  { %575 = vmatpush3.bf16.msra.mxu0 %v621_v8  ;;  %608 = vmatpush3.bf16.msra.mxu1 %v621_v8 }
  0x41   :  { %576 = vmatprep.subr.bf16.mxu0 %v622_v9  ;;  %601 = vmatprep.subr.bf16.mxu1 %v622_v9 }
  0x44   :  { %577 = vmatpush3.bf16.msra.mxu0 %v622_v9  ;;  %609 = vmatpush3.bf16.msra.mxu1 %v622_v9 }
  0x47   :  { %579 = vmatmul.mubr.bf16.vlgmr.msra.gmra.mrb[0].mxu0 %v625_v10  ;;  %587 = vmatmul.mubr.bf16.vlgmr.msra.gmra.mrb[0].mxu1 %v626_v11 }
  0x48   :  { %582 = vmatprep.mubr.bf16.mxu0 %v627_v12  ;;  %590 = vmatprep.mubr.bf16.mxu1 %v628_v13 }
  0x4f   :  { %583 = vmatmul.mubr.bf16.gmra.mrb[4].mxu0 %v629_v14  ;;  %591 = vmatmul.mubr.bf16.gmra.mrb[4].mxu1 %v630_v15 }
 0x11a   :  { %v580_v16 = vpop.f32.mrb[0].mxu0  ;;  %v588_v17 = vpop.f32.mrb[0].mxu1 }
 0x11b   :  { %v239_v18 = vpop.f32.mrb[1].mxu0  ;;  %v271_v19 = vpop.f32.mrb[1].mxu1 }
 0x11c   :  { %v581_v20 = vpop.f32.mrb[2].mxu0  ;;  %v589_v21 = vpop.f32.mrb[2].mxu1 }
 0x11d   :  { %v507_v22 = vpack.c.bf16 %v581_v20, %v580_v16  ;;  %v527_v23 = vpack.c.bf16 %v589_v21, %v588_v17  ;;  %v242_v24 = vpop.f32.mrb[3].mxu0  ;;  %v274_v25 = vpop.f32.mrb[3].mxu1 }
 0x11e   :  { %v502_v26 = vpack.c.bf16 %v242_v24, %v239_v18  ;;  %v522_v27 = vpack.c.bf16 %v274_v25, %v271_v19 }
 0x11f   :  { %539 = vst [vmem:[#allocation8 + $0x8] sm:$0xff] %v507_v22   ;;  %543 = vst [vmem:[#allocation8 + $0x28] sm:$0xff] %v527_v23  }
 0x120   :  { %503 = vst [vmem:[#allocation8] sm:$0xff] %v502_v26   ;;  %542 = vst [vmem:[#allocation8 + $0x20] sm:$0xff] %v522_v27  }
 0x122   :  { %v584_v28 = vpop.f32.mrb[4].mxu0  ;;  %v592_v29 = vpop.f32.mrb[4].mxu1 }
 0x123   :  { %v255_v30 = vpop.f32.mrb[5].mxu0  ;;  %v287_v31 = vpop.f32.mrb[5].mxu1 }
 0x124   :  { %v585_v32 = vpop.f32.mrb[6].mxu0  ;;  %v593_v33 = vpop.f32.mrb[6].mxu1 }
 0x125   :  { %v517_v34 = vpack.c.bf16 %v585_v32, %v584_v28  ;;  %v537_v35 = vpack.c.bf16 %v593_v33, %v592_v29  ;;  %v258_v36 = vpop.f32.mrb[7].mxu0  ;;  %v290_v37 = vpop.f32.mrb[7].mxu1 }
 0x126   :  { %v512_v38 = vpack.c.bf16 %v258_v36, %v255_v30  ;;  %v532_v39 = vpack.c.bf16 %v290_v37, %v287_v31 }
 0x127   :  { %541 = vst [vmem:[#allocation8 + $0x18] sm:$0xff] %v517_v34   ;;  %545 = vst [vmem:[#allocation8 + $0x38] sm:$0xff] %v537_v35  }
 0x128   :  { %540 = vst [vmem:[#allocation8 + $0x10] sm:$0xff] %v512_v38   ;;  %544 = vst [vmem:[#allocation8 + $0x30] sm:$0xff] %v532_v39  }
 0x129   :  { %686 = shalt.err (!%p683_p6)
}
 0x12a   :  { %s687_s10 = scalar_lea.hbm %s770_s2, 1024 }
 0x12b   :  { %p688_p7 = scmp.ne.s32.totalorder %s770_s2, %s687_s10  ;;  %p691_p8 = scmp.lt.u32.totalorder %s687_s10, %s770_s2 }
 0x12d   :  { %p693_p9 = pnand %p691_p8, %p688_p7 }
 0x12f   :  { %696 = shalt.err (!%p693_p9)
}
 0x130   :  { %444 = dma.vmem_to_hbm [thread:$0]  %s439_s6, 1024, %s770_s2, [#allocation5], %s704_s19, %s704_s19, %s705_s20  }
 0x131   :  { %701 = dma.done.wait [#allocation5], 1024  }
 0x132   :  { %702 = vsyncadd [#allocation5], 4294966272 }
 0x133   :  { %448 = vsyncpa [#allocation4], 1 }
 0x134   :  { %449 = vsyncpa [#allocation7], 1 }
 0x135   :  { %450 = vsyncpa [#allocation5], 1 }

</bundles_post_ra>
